<compile_context>
chip_gen: v6e
topology: v6e:2x2x1
jax: 0.10.0
libtpu: 0.0.40
codegen_flags: <defaults>
</compile_context>

<pallas_src>
import functools
import math

import jax
import jax.numpy as jnp
from jax.experimental import pallas as pl
from jax.experimental.pallas import tpu as pltpu

_EPS = 1e-6
_VMEM_LIMIT = 48 * 1024 * 1024   # <= ~48 MiB so the kernels also fit v7x's 64 MiB VMEM/TC

ARCH_SETTINGS = {
    'tiny':   ([3, 3, 9, 3],  [96, 192, 384, 768]),
    'small':  ([3, 3, 27, 3], [96, 192, 384, 768]),
    'base':   ([3, 3, 27, 3], [128, 256, 512, 1024]),
    'large':  ([3, 3, 27, 3], [192, 384, 768, 1536]),
    'xlarge': ([3, 3, 27, 3], [256, 512, 1024, 2048]),
}


# ------------------------------ small helpers --------------------------------

def _cparams(semantics):
    return pltpu.CompilerParams(dimension_semantics=semantics,
                                vmem_limit_bytes=_VMEM_LIMIT)


def _row_spec(shape, tm):
    nd = len(shape)
    blk = (tm,) + tuple(shape[1:])
    return pl.BlockSpec(blk, lambda i, _nd=nd: (i,) + (0,) * (_nd - 1))


def _rep_spec(shape):
    nd = len(shape)
    return pl.BlockSpec(tuple(shape), lambda i, _nd=nd: (0,) * _nd)


def _pick_tm(m, cap):
    return m if m <= cap else cap


# ------------------------------- Pallas kernels -------------------------------

def _gelu_exact(x):
    # Exact (erf-based) GELU, matching torch.nn.GELU() default.
    # TODO(synk): erf uses the Abramowitz-Stegun 7.1.26 polynomial (|err| < 1.5e-7)
    #             since lax.erf is not guaranteed to lower in Mosaic.
    a1, a2, a3, a4, a5 = 0.254829592, -0.284496736, 1.421413741, -1.453152027, 1.061405429
    p = 0.3275911
    z = x * 0.7071067811865476
    s = jnp.where(z >= 0.0, 1.0, -1.0)
    az = jnp.abs(z)
    t = 1.0 / (1.0 + p * az)
    poly = ((((a5 * t + a4) * t + a3) * t + a2) * t + a1) * t
    erf = s * (1.0 - poly * jnp.exp(-az * az))
    return x * 0.5 * (1.0 + erf)


def _ln_kernel(x_ref, g_ref, b_ref, o_ref, *, eps):
    x = x_ref[...]
    mu = jnp.mean(x, axis=-1, keepdims=True)
    xc = x - mu
    var = jnp.mean(xc * xc, axis=-1, keepdims=True)
    o_ref[...] = xc * jax.lax.rsqrt(var + eps) * g_ref[...] + b_ref[...]


def _matmul_bias_kernel(x_ref, w_ref, b_ref, o_ref):
    o_ref[...] = jnp.dot(x_ref[...], w_ref[...],
                         preferred_element_type=jnp.float32) + b_ref[...]


def _matmul_bias_ln_kernel(x_ref, w_ref, b_ref, g_ref, beta_ref, o_ref, *, eps):
    # Conv-as-matmul (bf16 operands, f32 acc) with a channels_first-LN epilogue (stem).
    h = jnp.dot(x_ref[...], w_ref[...], preferred_element_type=jnp.float32) + b_ref[...]
    mu = jnp.mean(h, axis=-1, keepdims=True)
    hc = h - mu
    var = jnp.mean(hc * hc, axis=-1, keepdims=True)
    o_ref[...] = hc * jax.lax.rsqrt(var + eps) * g_ref[...] + beta_ref[...]


def _ln_patch_matmul_kernel(x_ref, m_ref, g_ref, b_ref, w_ref, bias_ref, o_ref, *, eps):
    # Downsample layer: LayerNorm (channels_first) fused with the (3,2,2)/(1,2,2) conv.
    # x_ref: (TM, P, C) raw patch taps; m_ref: (TM, P) temporal-tap validity mask;
    # w_ref: (P, C, N) bf16; output is accumulated tap-by-tap on the MXU.
    P = x_ref.shape[1]
    m = m_ref[...]
    g = g_ref[...]
    beta = b_ref[...]
    acc = jnp.zeros(o_ref.shape, jnp.float32)
    for p in range(P):
        xp = x_ref[:, p, :]                               # (TM, C)
        mu = jnp.mean(xp, axis=-1, keepdims=True)
        xc = xp - mu
        var = jnp.mean(xc * xc, axis=-1, keepdims=True)
        y = (xc * jax.lax.rsqrt(var + eps) * g + beta) * m[:, p:p + 1]
        acc = acc + jnp.dot(y.astype(jnp.bfloat16), w_ref[p],
                            preferred_element_type=jnp.float32)
    o_ref[...] = acc + bias_ref[...]


def _dwconv_kernel(x_ref, w_ref, b_ref, o_ref, *, KT, KH, KW):
    # x_ref: (1, Tp, Hp, Wp, C) padded volume of one batch element (re-used across T);
    # o_ref: (1, 1, H, W, C) one output time step -> small register-friendly accumulator.
    t = pl.program_id(1)
    _, _, H, W, C = o_ref.shape
    acc = jnp.zeros((H, W, C), jnp.float32)
    for kt in range(KT):
        slab = x_ref[0, pl.ds(t + kt, 1)][0]              # (Hp, Wp, C)
        for kh in range(KH):
            for kw in range(KW):
                idx = kt * KH * KW + kh * KW + kw
                acc = acc + slab[kh:kh + H, kw:kw + W, :] * w_ref[idx, :]
    o_ref[0, 0] = acc + b_ref[0]


def _block_tail_kernel(xin_ref, xdw_ref, lg_ref, lb_ref,
                       w1_ref, b1_ref, w2_ref, b2_ref, gm_ref, o_ref, *, eps):
    x = xdw_ref[...]
    mu = jnp.mean(x, axis=-1, keepdims=True)
    xc = x - mu
    var = jnp.mean(xc * xc, axis=-1, keepdims=True)
    y = xc * jax.lax.rsqrt(var + eps) * lg_ref[...] + lb_ref[...]
    h = jnp.dot(y.astype(jnp.bfloat16), w1_ref[...],
                preferred_element_type=jnp.float32) + b1_ref[...]
    h = _gelu_exact(h)
    z = jnp.dot(h.astype(jnp.bfloat16), w2_ref[...],
                preferred_element_type=jnp.float32) + b2_ref[...]
    o_ref[...] = xin_ref[...] + gm_ref[...] * z


# ------------------------------ kernel wrappers -------------------------------

def pallas_layernorm(x, g, b, eps=_EPS, tm_cap=512):
    shp = x.shape
    C = shp[-1]
    M = math.prod(shp[:-1])
    tm = _pick_tm(M, tm_cap)
    out = pl.pallas_call(
        functools.partial(_ln_kernel, eps=eps),
        out_shape=jax.ShapeDtypeStruct((M, C), jnp.float32),
        grid=(pl.cdiv(M, tm),),
        in_specs=[_row_spec((M, C), tm), _rep_spec((1, C)), _rep_spec((1, C))],
        out_specs=_row_spec((M, C), tm),
        compiler_params=_cparams(("parallel",)),
    )(x.reshape(M, C), g.reshape(1, C), b.reshape(1, C))
    return out.reshape(shp)


def pallas_matmul_bias(x2, w, b, tm_cap=512):
    M, K = x2.shape
    N = w.shape[1]
    tm = _pick_tm(M, tm_cap)
    return pl.pallas_call(
        _matmul_bias_kernel,
        out_shape=jax.ShapeDtypeStruct((M, N), jnp.float32),
        grid=(pl.cdiv(M, tm),),
        in_specs=[_row_spec((M, K), tm), _rep_spec((K, N)), _rep_spec((1, N))],
        out_specs=_row_spec((M, N), tm),
        compiler_params=_cparams(("parallel",)),
    )(x2.astype(jnp.bfloat16), w.astype(jnp.bfloat16), b.reshape(1, N))


def pallas_matmul_bias_ln(x2, w, b, g, beta, eps=_EPS, tm_cap=512):
    M, K = x2.shape
    N = w.shape[1]
    tm = _pick_tm(M, tm_cap)
    return pl.pallas_call(
        functools.partial(_matmul_bias_ln_kernel, eps=eps),
        out_shape=jax.ShapeDtypeStruct((M, N), jnp.float32),
        grid=(pl.cdiv(M, tm),),
        in_specs=[_row_spec((M, K), tm), _rep_spec((K, N)), _rep_spec((1, N)),
                  _rep_spec((1, N)), _rep_spec((1, N))],
        out_specs=_row_spec((M, N), tm),
        compiler_params=_cparams(("parallel",)),
    )(x2.astype(jnp.bfloat16), w.astype(jnp.bfloat16),
      b.reshape(1, N), g.reshape(1, N), beta.reshape(1, N))


def pallas_ln_patch_matmul(xp, mask, g, b, w, bias, eps=_EPS, tm_cap=256):
    M, P, C = xp.shape
    N = w.shape[-1]
    tm = _pick_tm(M, tm_cap)
    return pl.pallas_call(
        functools.partial(_ln_patch_matmul_kernel, eps=eps),
        out_shape=jax.ShapeDtypeStruct((M, N), jnp.float32),
        grid=(pl.cdiv(M, tm),),
        in_specs=[_row_spec((M, P, C), tm), _row_spec((M, P), tm),
                  _rep_spec((1, C)), _rep_spec((1, C)),
                  _rep_spec((P, C, N)), _rep_spec((1, N))],
        out_specs=_row_spec((M, N), tm),
        compiler_params=_cparams(("parallel",)),
    )(xp, mask, g.reshape(1, C), b.reshape(1, C),
      w.astype(jnp.bfloat16), bias.reshape(1, N))


def pallas_dwconv3d(x, w_pt, b):
    # x: (N, T, H, W, C);  w_pt: (C, 1, KT, KH, KW) PyTorch depthwise layout; b: (C,)
    N, T, H, W, C = x.shape
    KT, KH, KW = w_pt.shape[2:]
    pt, ph, pw = (KT - 1) // 2, (KH - 1) // 2, (KW - 1) // 2
    xp = jnp.pad(x, ((0, 0), (pt, pt), (ph, ph), (pw, pw), (0, 0)))
    Tp, Hp, Wp = xp.shape[1:4]
    K = KT * KH * KW
    wm = jnp.transpose(w_pt.reshape(C, K))                    # (K, C)
    return pl.pallas_call(
        functools.partial(_dwconv_kernel, KT=KT, KH=KH, KW=KW),
        out_shape=jax.ShapeDtypeStruct((N, T, H, W, C), jnp.float32),
        grid=(N, T),
        in_specs=[pl.BlockSpec((1, Tp, Hp, Wp, C), lambda n, t: (n, 0, 0, 0, 0)),
                  pl.BlockSpec((K, C), lambda n, t: (0, 0)),
                  pl.BlockSpec((1, C), lambda n, t: (0, 0))],
        out_specs=pl.BlockSpec((1, 1, H, W, C), lambda n, t: (n, t, 0, 0, 0)),
        compiler_params=_cparams(("parallel", "arbitrary")),
    )(xp, wm, b.reshape(1, C))


def pallas_block_tail(x_in, x_dw, p, eps=_EPS):
    shp = x_in.shape
    C = shp[-1]
    H4 = 4 * C
    M = math.prod(shp[:-1])
    tm = _pick_tm(M, 256 if C >= 512 else 512)
    out = pl.pallas_call(
        functools.partial(_block_tail_kernel, eps=eps),
        out_shape=jax.ShapeDtypeStruct((M, C), jnp.float32),
        grid=(pl.cdiv(M, tm),),
        in_specs=[_row_spec((M, C), tm), _row_spec((M, C), tm),
                  _rep_spec((1, C)), _rep_spec((1, C)),
                  _rep_spec((C, H4)), _rep_spec((1, H4)),
                  _rep_spec((H4, C)), _rep_spec((1, C)),
                  _rep_spec((1, C))],
        out_specs=_row_spec((M, C), tm),
        input_output_aliases={0: 0},     # residual input aliases the output buffer
        compiler_params=_cparams(("parallel",)),
    )(x_in.reshape(M, C), x_dw.reshape(M, C),
      p['ln_g'].reshape(1, C), p['ln_b'].reshape(1, C),
      p['w1_t'].astype(jnp.bfloat16), p['b1'].reshape(1, H4),
      p['w2_t'].astype(jnp.bfloat16), p['b2'].reshape(1, C),
      p['gamma'].reshape(1, C))
    return out.reshape(shp)


# ------------------------- conv-as-matmul glue (im2col) ----------------------

def _conv_patches_pc(x, kt, ks):
    # Conv kernel (kt, ks, ks), stride (1, ks, ks), padding ((kt-1)//2, 0, 0).
    # Returns (N, T, Ho, Wo, P, C) with P ordered (kt, kh, kw).
    N, T, H, W, C = x.shape
    Ho, Wo = H // ks, W // ks
    x = x[:, :, :Ho * ks, :Wo * ks]
    pt = (kt - 1) // 2
    xp = jnp.pad(x, ((0, 0), (pt, pt), (0, 0), (0, 0), (0, 0)))
    taps = jnp.stack([xp[:, d:d + T] for d in range(kt)], axis=2)     # (N,T,kt,H,W,C)
    taps = taps.reshape(N, T, kt, Ho, ks, Wo, ks, C)
    taps = taps.transpose(0, 1, 3, 5, 2, 4, 6, 7)                     # (N,T,Ho,Wo,kt,kh,kw,C)
    return taps.reshape(N, T, Ho, Wo, kt * ks * ks, C)


def stem_forward(x, p):
    # Conv3d(3, C0, (3,4,4), stride (1,4,4), pad (1,0,0)) + channels_first LN, fused.
    cout, _, kt, ks, _ = p['conv_w'].shape
    patches = _conv_patches_pc(x, kt, ks)
    N, T, Ho, Wo, P, C = patches.shape
    M = N * T * Ho * Wo
    wm = jnp.transpose(p['conv_w'], (2, 3, 4, 1, 0)).reshape(P * C, cout)
    out = pallas_matmul_bias_ln(patches.reshape(M, P * C), wm,
                                p['conv_b'], p['ln_g'], p['ln_b'])
    return out.reshape(N, T, Ho, Wo, cout)


def downsample_forward(x, p):
    # channels_first LN + Conv3d(Cin, Cout, (3,2,2), stride (1,2,2), pad (1,0,0)),
    # LN fused into the conv matmul kernel; the temporal-tap mask zeroes the taps
    # that came from the conv's zero padding (exactly matching LN-before-conv).
    cout, _, kt, ks, _ = p['conv_w'].shape
    patches = _conv_patches_pc(x, kt, ks)
    N, T, Ho, Wo, P, C = patches.shape
    M = N * T * Ho * Wo
    wm = jnp.transpose(p['conv_w'], (2, 3, 4, 1, 0)).reshape(P, C, cout)
    pt = (kt - 1) // 2
    tk = jnp.arange(T)[:, None] + jnp.arange(kt)[None, :] - pt        # original time idx
    valid_t = ((tk >= 0) & (tk < T)).astype(jnp.float32)              # (T, kt)
    mask = jnp.broadcast_to(valid_t[None, :, None, None, :, None],
                            (N, T, Ho, Wo, kt, ks * ks)).reshape(M, P)
    out = pallas_ln_patch_matmul(patches.reshape(M, P, C), mask,
                                 p['ln_g'], p['ln_b'], wm, p['conv_b'])
    return out.reshape(N, T, Ho, Wo, cout)


def lateral_conv3d(x, w_pt, stride):
    # nn.Conv3d(cin, cout, (kt,1,1), stride=(stride,1,1), padding=((kt-1)//2,0,0), bias=False)
    cout, cin, kt = w_pt.shape[0], w_pt.shape[1], w_pt.shape[2]
    N, T, H, W, C = x.shape
    pt = (kt - 1) // 2
    xp = jnp.pad(x, ((0, 0), (pt, pt), (0, 0), (0, 0), (0, 0)))
    Tp = T + 2 * pt
    To = (Tp - kt) // stride + 1
    taps = jnp.stack([xp[:, d:d + stride * (To - 1) + 1:stride] for d in range(kt)],
                     axis=4)                                          # (N,To,H,W,kt,C)
    patches = taps.reshape(N * To * H * W, kt * C)
    wm = jnp.transpose(w_pt.reshape(cout, cin, kt), (2, 1, 0)).reshape(kt * cin, cout)
    out = pallas_matmul_bias(patches, wm, jnp.zeros((cout,), jnp.float32))
    return out.reshape(N, To, H, W, cout)


# ----------------------------- model forward ---------------------------------

def block3d_forward(x, p):
    x_dw = pallas_dwconv3d(x, p['dw_w'], p['dw_b'])
    return pallas_block_tail(x, x_dw, p)       # drop_path rates are all 0.0 -> identity


def convnext3d_slowfast_forward(x_ncdhw, params, resample_rate=8, speed_ratio=8):
    x = jnp.transpose(x_ncdhw, (0, 2, 3, 4, 1)).astype(jnp.float32)   # NCDHW -> NDHWC
    # nearest-neighbour temporal downsampling == strided temporal slicing
    x_slow = x[:, ::resample_rate]
    x_fast = x[:, ::(resample_rate // speed_ratio)]
    for i in range(3):
        if i == 0:
            x_slow = stem_forward(x_slow, params['slow']['down'][0])
            x_fast = stem_forward(x_fast, params['fast']['down'][0])
        else:
            x_slow = downsample_forward(x_slow, params['slow']['down'][i])
            x_fast = downsample_forward(x_fast, params['fast']['down'][i])
        for bp in params['slow']['stages'][i]:
            x_slow = block3d_forward(x_slow, bp)
        for bp in params['fast']['stages'][i]:
            x_fast = block3d_forward(x_fast, bp)
        lat = lateral_conv3d(x_fast, params['lateral'][i], stride=speed_ratio)
        x_slow = jnp.concatenate([x_slow, lat], axis=-1)
    x_slow = downsample_forward(x_slow, params['slow']['down'][3])
    x_fast = downsample_forward(x_fast, params['fast']['down'][3])
    for bp in params['slow']['stages'][3]:
        x_slow = block3d_forward(x_slow, bp)
    for bp in params['fast']['stages'][3]:
        x_fast = block3d_forward(x_fast, bp)
    x_slow = pallas_layernorm(x_slow, params['slow']['norm_g'], params['slow']['norm_b'])
    x_fast = pallas_layernorm(x_fast, params['fast']['norm_g'], params['fast']['norm_b'])
    return (jnp.transpose(x_slow, (0, 4, 1, 2, 3)),                   # back to NCDHW
            jnp.transpose(x_fast, (0, 4, 1, 2, 3)))


# -------------------------- deterministic parameters -------------------------

class _KeyGen:
    def __init__(self, key):
        self._key = key

    def __call__(self):
        self._key, sub = jax.random.split(self._key)
        return sub


def _trunc_normal(key, shape, std=0.02):
    return std * jax.random.truncated_normal(key, -2.0, 2.0, shape, jnp.float32)


def _make_block_params(kg, dim):
    return dict(
        dw_w=_trunc_normal(kg(), (dim, 1, 3, 7, 7)),               # depthwise Conv3d weight
        dw_b=jnp.zeros((dim,), jnp.float32),
        ln_g=jnp.ones((dim,), jnp.float32),
        ln_b=jnp.zeros((dim,), jnp.float32),
        w1_t=jnp.transpose(_trunc_normal(kg(), (4 * dim, dim))),   # Linear(dim,4dim).weight.T
        b1=jnp.zeros((4 * dim,), jnp.float32),
        w2_t=jnp.transpose(_trunc_normal(kg(), (dim, 4 * dim))),   # Linear(4dim,dim).weight.T
        b2=jnp.zeros((dim,), jnp.float32),
        gamma=jnp.full((dim,), 1e-6, jnp.float32),
    )


def _make_stem_params(kg, cin, cout):
    return dict(conv_w=_trunc_normal(kg(), (cout, cin, 3, 4, 4)),
                conv_b=jnp.zeros((cout,), jnp.float32),
                ln_g=jnp.ones((cout,), jnp.float32),
                ln_b=jnp.zeros((cout,), jnp.float32))


def _make_down_params(kg, cin, cout):
    return dict(ln_g=jnp.ones((cin,), jnp.float32),
                ln_b=jnp.zeros((cin,), jnp.float32),
                conv_w=_trunc_normal(kg(), (cout, cin, 3, 2, 2)),
                conv_b=jnp.zeros((cout,), jnp.float32))


def _make_pathway_params(kg, dims, depths, is_slow):
    down = [_make_stem_params(kg, 3, dims[0])]
    for i in range(3):
        cin = dims[i] + dims[i] // 4 if is_slow else dims[i]
        down.append(_make_down_params(kg, cin, dims[i + 1]))
    stages = [[_make_block_params(kg, dims[i]) for _ in range(depths[i])] for i in range(4)]
    return dict(down=down, stages=stages,
                norm_g=jnp.ones((dims[-1],), jnp.float32),
                norm_b=jnp.zeros((dims[-1],), jnp.float32))


def make_convnext3d_slowfast_params(key, name='tiny', channel_ratio=8, fusion_kernel=5):
    depths, dims = ARCH_SETTINGS[name]
    fdims = [d // channel_ratio for d in dims]
    kg = _KeyGen(key)
    slow = _make_pathway_params(kg, dims, depths, is_slow=True)
    fast = _make_pathway_params(kg, fdims, depths, is_slow=False)
    lateral = [_trunc_normal(kg(), (dims[i] * 2 // channel_ratio, fdims[i],
                                    fusion_kernel, 1, 1)) for i in range(3)]
    return dict(slow=slow, fast=fast, lateral=lateral)


# ----------------------------------- main -------------------------------------

if __name__ == "__main__":
    root = jax.random.PRNGKey(0)
    pkey, xkey = jax.random.split(root)
    params = make_convnext3d_slowfast_params(pkey, name='tiny')

    # Small input consistent with the module (PyTorch NCDHW): N=2, C=3, T=16, H=W=32.
    x = jax.random.normal(xkey, (2, 3, 16, 32, 32), jnp.float32)

    out_slow, out_fast = convnext3d_slowfast_forward(
        x, params, resample_rate=8, speed_ratio=8)
    out_slow, out_fast = jax.block_until_ready((out_slow, out_fast))

    assert out_slow.shape == (2, 768, 2, 1, 1), out_slow.shape
    assert out_fast.shape == (2, 96, 16, 1, 1), out_fast.shape
    assert bool(jnp.all(jnp.isfinite(out_slow))) and bool(jnp.all(jnp.isfinite(out_fast)))
    print("KERNEL_OK")
</pallas_src>

<mosaic_0001>
module attributes {stable_mosaic.version = 11 : i64} {
  func.func @_matmul_bias_ln_kernel(%arg0: i32, %arg1: memref<256x144xbf16, #tpu.memory_space<vmem>>, %arg2: memref<144x96xbf16, #tpu.memory_space<vmem>>, %arg3: memref<1x96xf32, #tpu.memory_space<vmem>>, %arg4: memref<1x96xf32, #tpu.memory_space<vmem>>, %arg5: memref<1x96xf32, #tpu.memory_space<vmem>>, %arg6: memref<256x96xf32, #tpu.memory_space<vmem>>) attributes {dimension_semantics = [#tpu.dimension_semantics<parallel>], iteration_bounds = array<i64: 1>, scalar_prefetch = 0 : i64, scratch_operands = 0 : i64, tpu.core_type = #tpu.core_type<tc>, window_params = [{transform_indices = @transform_0, window_bounds = array<i64: 256, 144>}, {pipeline_mode = #tpu.pipeline_mode<synchronous>, transform_indices = @transform_1, window_bounds = array<i64: 144, 96>}, {pipeline_mode = #tpu.pipeline_mode<synchronous>, transform_indices = @transform_2, window_bounds = array<i64: 1, 96>}, {pipeline_mode = #tpu.pipeline_mode<synchronous>, transform_indices = @transform_3, window_bounds = array<i64: 1, 96>}, {pipeline_mode = #tpu.pipeline_mode<synchronous>, transform_indices = @transform_4, window_bounds = array<i64: 1, 96>}, {transform_indices = @transform_5, window_bounds = array<i64: 256, 96>}]} {
    %c0 = arith.constant 0 : index
    %c0_0 = arith.constant 0 : index
    %0 = vector.load %arg1[%c0, %c0_0] : memref<256x144xbf16, #tpu.memory_space<vmem>>, vector<256x144xbf16>
    %c0_1 = arith.constant 0 : index
    %c0_2 = arith.constant 0 : index
    %1 = vector.load %arg2[%c0_1, %c0_2] : memref<144x96xbf16, #tpu.memory_space<vmem>>, vector<144x96xbf16>
    %cst = arith.constant dense<0.000000e+00> : vector<256x96xf32>
    %2 = tpu.matmul %0, %1, %cst {dimension_numbers = #tpu.dot_dimension_numbers<[1], [0], [0], [1], [0, 0, 1, 1], [], []>} : vector<256x144xbf16>, vector<144x96xbf16>, vector<256x96xf32> -> vector<256x96xf32>
    %c0_3 = arith.constant 0 : index
    %c0_4 = arith.constant 0 : index
    %3 = vector.load %arg3[%c0_3, %c0_4] : memref<1x96xf32, #tpu.memory_space<vmem>>, vector<1x96xf32>
    %4 = vector.broadcast %3 : vector<1x96xf32> to vector<256x96xf32>
    %5 = arith.addf %2, %4 : vector<256x96xf32>
    %cst_5 = arith.constant dense<0.000000e+00> : vector<256xf32>
    %6 = vector.multi_reduction <add>, %5, %cst_5 [1] : vector<256x96xf32> to vector<256xf32>
    %7 = vector.shape_cast %6 : vector<256xf32> to vector<256x1xf32>
    %cst_6 = arith.constant 9.600000e+01 : f32
    %8 = vector.broadcast %cst_6 : f32 to vector<256x1xf32>
    %9 = arith.divf %7, %8 : vector<256x1xf32>
    %10 = vector.broadcast %9 : vector<256x1xf32> to vector<256x96xf32>
    %11 = arith.subf %5, %10 : vector<256x96xf32>
    %12 = arith.mulf %11, %11 : vector<256x96xf32>
    %cst_7 = arith.constant dense<0.000000e+00> : vector<256xf32>
    %13 = vector.multi_reduction <add>, %12, %cst_7 [1] : vector<256x96xf32> to vector<256xf32>
    %14 = vector.shape_cast %13 : vector<256xf32> to vector<256x1xf32>
    %cst_8 = arith.constant 9.600000e+01 : f32
    %15 = vector.broadcast %cst_8 : f32 to vector<256x1xf32>
    %16 = arith.divf %14, %15 : vector<256x1xf32>
    %cst_9 = arith.constant 9.99999997E-7 : f32
    %17 = vector.broadcast %cst_9 : f32 to vector<256x1xf32>
    %18 = arith.addf %16, %17 : vector<256x1xf32>
    %19 = math.rsqrt %18 : vector<256x1xf32>
    %20 = vector.broadcast %19 : vector<256x1xf32> to vector<256x96xf32>
    %21 = arith.mulf %11, %20 : vector<256x96xf32>
    %c0_10 = arith.constant 0 : index
    %c0_11 = arith.constant 0 : index
    %22 = vector.load %arg4[%c0_10, %c0_11] : memref<1x96xf32, #tpu.memory_space<vmem>>, vector<1x96xf32>
    %23 = vector.broadcast %22 : vector<1x96xf32> to vector<256x96xf32>
    %24 = arith.mulf %21, %23 : vector<256x96xf32>
    %c0_12 = arith.constant 0 : index
    %c0_13 = arith.constant 0 : index
    %25 = vector.load %arg5[%c0_12, %c0_13] : memref<1x96xf32, #tpu.memory_space<vmem>>, vector<1x96xf32>
    %26 = vector.broadcast %25 : vector<1x96xf32> to vector<256x96xf32>
    %27 = arith.addf %24, %26 : vector<256x96xf32>
    %c0_14 = arith.constant 0 : index
    %c0_15 = arith.constant 0 : index
    %28 = vector.load %arg6[%c0_14, %c0_15] : memref<256x96xf32, #tpu.memory_space<vmem>>, vector<256x96xf32>
    tpu.vector_store %arg6[%c0_14, %c0_15], %27 {strides = array<i32>} : memref<256x96xf32, #tpu.memory_space<vmem>>, vector<256x96xf32>,
    return
  }
  func.func @transform_0(%arg0: i32) -> (i32, i32) {
    %c0_i32 = arith.constant 0 : i32
    %c0_i32_0 = arith.constant 0 : i32
    return %arg0, %c0_i32 : i32, i32
  }
  func.func @transform_1(%arg0: i32) -> (i32, i32) {
    %c0_i32 = arith.constant 0 : i32
    %c0_i32_0 = arith.constant 0 : i32
    %c0_i32_1 = arith.constant 0 : i32
    return %c0_i32, %c0_i32_0 : i32, i32
  }
  func.func @transform_2(%arg0: i32) -> (i32, i32) {
    %c0_i32 = arith.constant 0 : i32
    %c0_i32_0 = arith.constant 0 : i32
    %c0_i32_1 = arith.constant 0 : i32
    return %c0_i32, %c0_i32_0 : i32, i32
  }
  func.func @transform_3(%arg0: i32) -> (i32, i32) {
    %c0_i32 = arith.constant 0 : i32
    %c0_i32_0 = arith.constant 0 : i32
    %c0_i32_1 = arith.constant 0 : i32
    return %c0_i32, %c0_i32_0 : i32, i32
  }
  func.func @transform_4(%arg0: i32) -> (i32, i32) {
    %c0_i32 = arith.constant 0 : i32
    %c0_i32_0 = arith.constant 0 : i32
    %c0_i32_1 = arith.constant 0 : i32
    return %c0_i32, %c0_i32_0 : i32, i32
  }
  func.func @transform_5(%arg0: i32) -> (i32, i32) {
    %c0_i32 = arith.constant 0 : i32
    %c0_i32_0 = arith.constant 0 : i32
    return %arg0, %c0_i32 : i32, i32
  }
}

</mosaic_0001>

<bundles_post_ra>
// kernel: tpu_custom_call.1
= control target key start
LH: loop header
LB: loop body
LE: loop exit
PB: predicated region body
PF: predicated region fallthrough
CT: control target
= control target key end

     0   :  { %v1218_v0 = vmov 0   ;;  %vm276_vm0 = vcmask 130048   ;;  %vm486_vm1 = vcmask 785408   ;;  %s1979_s1 = inlined_call_operand.vmem [shape: bf16[144,96], index: 1, kind: input, shape index: {}]   ;;  %s1980_s0 = inlined_call_operand.vmem [shape: bf16[256,144], index: 0, kind: input, shape index: {}]   ;;  %s1981_s2 = inlined_call_operand.vmem [shape: f32[1,96], index: 2, kind: input, shape index: {}]   ;;  %s1982_s3 = inlined_call_operand.vmem [shape: f32[1,96], index: 3, kind: input, shape index: {}]   ;;  %s1983_s4 = inlined_call_operand.vmem [shape: f32[1,96], index: 4, kind: input, shape index: {}]   ;;  %s1984_s5 = inlined_call_operand.vmem [shape: f32[256,96], index: 5, kind: output, shape index: {}]  }
   0x1   :  { %325 = vmatprep.subr.bf16.mxu0 %v1218_v0  ;;  %1078 = vmatprep.subr.bf16.mxu1 %v1218_v0  ;;  %v1097_v1 = vld [vmem:[%s1979_s1 + $0x38] sm:$0xff]   ;;  %v1098_v2 = vld [vmem:[%s1979_s1 + $0x30] sm:$0xff]   ;;  %v1099_v3 = vld [vmem:[%s1979_s1 + $0x28] sm:$0xff]  }
   0x2   :  { %326 = vmatpush1.bf16.msra.mxu0 %v1097_v1  ;;  %1087 = vmatpush1.bf16.msra.mxu1 %v1097_v1  ;;  %v1100_v4 = vld [vmem:[%s1979_s1 + $0x20] sm:$0xff]   ;;  %v1101_v7 = vld [vmem:[%s1979_s1 + $0x18] sm:$0xff]   ;;  %v1102_v8 = vld [vmem:[%s1979_s1 + $0x10] sm:$0xff]  }
   0x3   :  { %327 = vmatprep.subr.bf16.mxu0 %v1218_v0  ;;  %1079 = vmatprep.subr.bf16.mxu1 %v1218_v0  ;;  %v1108_v5 = vld [vmem:[%s1980_s0 + $0x4] ss:$8 sps:$4 sm:$0xff]   ;;  %v1106_v12 = vld [vmem:[%s1980_s0] ss:$8 sps:$4 sm:$0xff]   ;;  %v1112_v14 = vld [vmem:[%s1980_s0 + $0x14] ss:$8 sps:$4 sm:$0xff]  }
   0x4   :  { %v1111_v6 = vld [vmem:[%s1980_s0 + $0x84] ss:$8 sps:$4 sm:$0xff]   ;;  %1060 = vmatprep.mubr.msk.bf16.mxu0 %vm276_vm0, %v1108_v5  ;;  %v1109_v13 = vld [vmem:[%s1980_s0 + $0x80] ss:$8 sps:$4 sm:$0xff]   ;;  %v1115_v15 = vld [vmem:[%s1980_s0 + $0x94] ss:$8 sps:$4 sm:$0xff]  }
   0x5   :  { %1068 = vmatprep.mubr.msk.bf16.mxu1 %vm276_vm0, %v1111_v6  ;;  %v1103_v9 = vld [vmem:[%s1979_s1 + $0x8] sm:$0xff]   ;;  %v1104_v10 = vld [vmem:[%s1979_s1] sm:$0xff]   ;;  %v1114_v16 = vld [vmem:[%s1980_s0 + $0x10] ss:$8 sps:$4 sm:$0xff]  }
   0x6   :  { %328 = vmatpush1.bf16.msra.mxu0 %v1098_v2  ;;  %1088 = vmatpush1.bf16.msra.mxu1 %v1098_v2  ;;  %v1105_v11 = vld [vmem:[%s1979_s1 + $0x40] sm:$0xff]   ;;  %v1117_v17 = vld [vmem:[%s1980_s0 + $0x90] ss:$8 sps:$4 sm:$0xff]   ;;  %v1124_v22 = vld [vmem:[%s1980_s0 + $0x34] ss:$8 sps:$4 sm:$0xff]  }
   0x7   :  { %329 = vmatprep.subr.bf16.mxu0 %v1218_v0  ;;  %1080 = vmatprep.subr.bf16.mxu1 %v1218_v0  ;;  %v1118_v18 = vld [vmem:[%s1980_s0 + $0x24] ss:$8 sps:$4 sm:$0xff]   ;;  %v1120_v20 = vld [vmem:[%s1980_s0 + $0x20] ss:$8 sps:$4 sm:$0xff]   ;;  %v1127_v23 = vld [vmem:[%s1980_s0 + $0xb4] ss:$8 sps:$4 sm:$0xff]  }
   0x8   :  { %v1121_v19 = vld [vmem:[%s1980_s0 + $0xa4] ss:$8 sps:$4 sm:$0xff]   ;;  %v1123_v21 = vld [vmem:[%s1980_s0 + $0xa0] ss:$8 sps:$4 sm:$0xff]   ;;  %v1126_v24 = vld [vmem:[%s1980_s0 + $0x30] ss:$8 sps:$4 sm:$0xff]  }
   0x9   :  { %v1129_v25 = vld [vmem:[%s1980_s0 + $0xb0] ss:$8 sps:$4 sm:$0xff]   ;;  %v1130_v26 = vld [vmem:[%s1980_s0 + $0x44] ss:$8 sps:$4 sm:$0xff]   ;;  %v1132_v28 = vld [vmem:[%s1980_s0 + $0x40] ss:$8 sps:$4 sm:$0xff]  }
   0xa   :  { %330 = vmatpush1.bf16.msra.mxu0 %v1099_v3  ;;  %1089 = vmatpush1.bf16.msra.mxu1 %v1099_v3  ;;  %v1133_v27 = vld [vmem:[%s1980_s0 + $0xc4] ss:$8 sps:$4 sm:$0xff]   ;;  %v1135_v29 = vld [vmem:[%s1980_s0 + $0xc0] ss:$8 sps:$4 sm:$0xff]   ;;  %v1136_v30 = vld [vmem:[%s1980_s0 + $0x54] ss:$8 sps:$4 sm:$0xff]  }
   0xb   :  { %331 = vmatprep.subr.bf16.mxu0 %v1218_v0  ;;  %1081 = vmatprep.subr.bf16.mxu1 %v1218_v0  ;;  %v1139_v31 = vld [vmem:[%s1980_s0 + $0xd4] ss:$8 sps:$4 sm:$0xff]   ;;  %v1138_v32 = vld [vmem:[%s1980_s0 + $0x50] ss:$8 sps:$4 sm:$0xff]   ;;  %v1142_v34 = vld [vmem:[%s1980_s0 + $0x64] ss:$8 sps:$4 sm:$0xff]  }
   0xc   :  { %v1141_v33 = vld [vmem:[%s1980_s0 + $0xd0] ss:$8 sps:$4 sm:$0xff]   ;;  %v1145_v35 = vld [vmem:[%s1980_s0 + $0xe4] ss:$8 sps:$4 sm:$0xff]   ;;  %v1144_v36 = vld [vmem:[%s1980_s0 + $0x60] ss:$8 sps:$4 sm:$0xff]  }
   0xd   :  { %v1147_v37 = vld [vmem:[%s1980_s0 + $0xe0] ss:$8 sps:$4 sm:$0xff]   ;;  %v1148_v38 = vld [vmem:[%s1980_s0 + $0x74] ss:$8 sps:$4 sm:$0xff]   ;;  %v1150_v40 = vld [vmem:[%s1980_s0 + $0x70] ss:$8 sps:$4 sm:$0xff]  }
   0xe   :  { %332 = vmatpush1.bf16.msra.mxu0 %v1100_v4  ;;  %1090 = vmatpush1.bf16.msra.mxu1 %v1100_v4  ;;  %v1151_v39 = vld [vmem:[%s1980_s0 + $0xf4] ss:$8 sps:$4 sm:$0xff]   ;;  %v1153_v41 = vld [vmem:[%s1980_s0 + $0xf0] ss:$8 sps:$4 sm:$0xff]   ;;  %v1391_v42 = vld [vmem:[%s1981_s2] ss:$0 sm:$0xff] }
   0xf   :  { %333 = vmatprep.subr.bf16.mxu0 %v1218_v0  ;;  %1082 = vmatprep.subr.bf16.mxu1 %v1218_v0 }
  0x12   :  { %334 = vmatpush1.bf16.msra.mxu0 %v1101_v7  ;;  %1091 = vmatpush1.bf16.msra.mxu1 %v1101_v7 }
  0x13   :  { %335 = vmatprep.subr.bf16.mxu0 %v1218_v0  ;;  %1083 = vmatprep.subr.bf16.mxu1 %v1218_v0 }
  0x16   :  { %336 = vmatpush1.bf16.msra.mxu0 %v1102_v8  ;;  %1092 = vmatpush1.bf16.msra.mxu1 %v1102_v8 }
  0x17   :  { %337 = vmatprep.subr.bf16.mxu0 %v1218_v0  ;;  %1084 = vmatprep.subr.bf16.mxu1 %v1218_v0 }
  0x1a   :  { %338 = vmatpush1.bf16.msra.mxu0 %v1103_v9  ;;  %1093 = vmatpush1.bf16.msra.mxu1 %v1103_v9 }
  0x1b   :  { %339 = vmatprep.subr.bf16.mxu0 %v1218_v0  ;;  %1085 = vmatprep.subr.bf16.mxu1 %v1218_v0 }
  0x1e   :  { %340 = vmatpush1.bf16.msra.mxu0 %v1104_v10  ;;  %1094 = vmatpush1.bf16.msra.mxu1 %v1104_v10 }
  0x1f   :  { %355 = vmatprep.subr.bf16.mxu0 %v1218_v0  ;;  %1086 = vmatprep.subr.bf16.mxu1 %v1218_v0 }
  0x22   :  { %356 = vmatpush2.bf16.msra.mxu0 %v1105_v11  ;;  %1095 = vmatpush2.bf16.msra.mxu1 %v1105_v11 }
  0x25   :  { %358 = vmatmul.mubr.bf16.vlgmr.msra.gmra.mxu0 %v1106_v12  ;;  %422 = vmatmul.mubr.bf16.vlgmr.msra.gmra.mxu1 %v1109_v13 }
  0x26   :  { %1061 = vmatprep.mubr.msk.bf16.mxu0 %vm276_vm0, %v1112_v14  ;;  %1069 = vmatprep.mubr.msk.bf16.mxu1 %vm276_vm0, %v1115_v15 }
  0x2d   :  { %366 = vmatmul.mubr.bf16.gmra.mxu0 %v1114_v16  ;;  %430 = vmatmul.mubr.bf16.gmra.mxu1 %v1117_v17 }
  0x2e   :  { %1062 = vmatprep.mubr.msk.bf16.mxu0 %vm276_vm0, %v1118_v18  ;;  %1070 = vmatprep.mubr.msk.bf16.mxu1 %vm276_vm0, %v1121_v19 }
  0x35   :  { %374 = vmatmul.mubr.bf16.gmra.mxu0 %v1120_v20  ;;  %438 = vmatmul.mubr.bf16.gmra.mxu1 %v1123_v21 }
  0x36   :  { %1063 = vmatprep.mubr.msk.bf16.mxu0 %vm276_vm0, %v1124_v22  ;;  %1071 = vmatprep.mubr.msk.bf16.mxu1 %vm276_vm0, %v1127_v23 }
  0x3d   :  { %382 = vmatmul.mubr.bf16.gmra.mxu0 %v1126_v24  ;;  %446 = vmatmul.mubr.bf16.gmra.mxu1 %v1129_v25 }
  0x3e   :  { %1064 = vmatprep.mubr.msk.bf16.mxu0 %vm276_vm0, %v1130_v26  ;;  %1072 = vmatprep.mubr.msk.bf16.mxu1 %vm276_vm0, %v1133_v27 }
  0x45   :  { %390 = vmatmul.mubr.bf16.gmra.mxu0 %v1132_v28  ;;  %454 = vmatmul.mubr.bf16.gmra.mxu1 %v1135_v29 }
  0x46   :  { %1065 = vmatprep.mubr.msk.bf16.mxu0 %vm276_vm0, %v1136_v30  ;;  %1073 = vmatprep.mubr.msk.bf16.mxu1 %vm276_vm0, %v1139_v31 }
  0x4d   :  { %398 = vmatmul.mubr.bf16.gmra.mxu0 %v1138_v32  ;;  %462 = vmatmul.mubr.bf16.gmra.mxu1 %v1141_v33 }
  0x4e   :  { %1066 = vmatprep.mubr.msk.bf16.mxu0 %vm276_vm0, %v1142_v34  ;;  %1074 = vmatprep.mubr.msk.bf16.mxu1 %vm276_vm0, %v1145_v35 }
  0x55   :  { %406 = vmatmul.mubr.bf16.gmra.mxu0 %v1144_v36  ;;  %470 = vmatmul.mubr.bf16.gmra.mxu1 %v1147_v37 }
  0x56   :  { %1067 = vmatprep.mubr.msk.bf16.mxu0 %vm276_vm0, %v1148_v38  ;;  %1075 = vmatprep.mubr.msk.bf16.mxu1 %vm276_vm0, %v1151_v39 }
  0x5d   :  { %414 = vmatmul.mubr.bf16.gmra.mxu0 %v1150_v40  ;;  %478 = vmatmul.mubr.bf16.gmra.mxu1 %v1153_v41 }
  0xe5   :  { %v359_v43 = vpop.f32.mrf.mxu0  ;;  %v423_v44 = vpop.f32.mrf.mxu1 }
  0xe6   :  { %v1394_v45 = vadd.f32 %v1391_v42, %v359_v43  ;;  %v1397_v46 = vadd.f32 %v1391_v42, %v423_v44 }
  0xe7   :  { %v361_v47 = vpop.f32.mrf.mxu0  ;;  %v425_v48 = vpop.f32.mrf.mxu1 }
  0xe8   :  { %v487_v49 = vsel %vm486_vm1, %v1394_v45, 0.0  ;;  %v535_v53 = vsel %vm486_vm1, %v1397_v46, 0.0 }
  0xe9   :  { %v362_v50 = vpop.f32.mrf.mxu0  ;;  %v426_v51 = vpop.f32.mrf.mxu1  ;;  %488 = vadd.xlane.f32.xlu0 %v487_v49 }
  0xea   :  { %v1402_v52 = vadd.f32 %v1391_v42, %v426_v51  ;;  %v1407_v56 = vadd.f32 %v1391_v42, %v362_v50 }
  0xeb   :  { %v364_v54 = vpop.f32.mrf.mxu0  ;;  %v428_v55 = vpop.f32.mrf.mxu1 }
  0xec   :  { %v538_v57 = vsel %vm486_vm1, %v1402_v52, 0.0  ;;  %v490_v1 = vsel %vm486_vm1, %v1407_v56, 0.0 }
  0xed   :  { %539 = vadd.xlane.f32.xlu1 %v538_v57  ;;  %v367_v58 = vpop.f32.mrf.mxu0  ;;  %536 = vadd.xlane.f32.xlu0 %v535_v53  ;;  %v431_v59 = vpop.f32.mrf.mxu1 }
  0xee   :  { %v1412_v60 = vadd.f32 %v1391_v42, %v367_v58  ;;  %v1415_v61 = vadd.f32 %v1391_v42, %v431_v59 }
  0xef   :  { %v369_v62 = vpop.f32.mrf.mxu0  ;;  %v433_v63 = vpop.f32.mrf.mxu1 }
  0xf0   :  { %v493_v0 = vsel %vm486_vm1, %v1412_v60, 0.0  ;;  %v541_v6 = vsel %vm486_vm1, %v1415_v61, 0.0 }
  0xf1   :  { %v370_v2 = vpop.f32.mrf.mxu0  ;;  %494 = vadd.xlane.f32.xlu1 %v493_v0  ;;  %491 = vadd.xlane.f32.xlu0 %v490_v1  ;;  %v434_v3 = vpop.f32.mrf.mxu1 }
  0xf2   :  { %v1422_v4 = vadd.f32 %v1391_v42, %v370_v2  ;;  %v1425_v5 = vadd.f32 %v1391_v42, %v434_v3 }
  0xf3   :  { %v372_v7 = vpop.f32.mrf.mxu0  ;;  %v436_v8 = vpop.f32.mrf.mxu1 }
  0xf4   :  { %v496_v9 = vsel %vm486_vm1, %v1422_v4, 0.0  ;;  %v544_v14 = vsel %vm486_vm1, %v1425_v5, 0.0 }
  0xf5   :  { %v375_v10 = vpop.f32.mrf.mxu0  ;;  %497 = vadd.xlane.f32.xlu1 %v496_v9  ;;  %542 = vadd.xlane.f32.xlu0 %v541_v6  ;;  %v439_v11 = vpop.f32.mrf.mxu1 }
  0xf6   :  { %v1432_v12 = vadd.f32 %v1391_v42, %v375_v10  ;;  %v1435_v13 = vadd.f32 %v1391_v42, %v439_v11 }
  0xf7   :  { %v377_v15 = vpop.f32.mrf.mxu0  ;;  %v441_v16 = vpop.f32.mrf.mxu1 }
  0xf8   :  { %v499_v17 = vsel %vm486_vm1, %v1432_v12, 0.0  ;;  %v547_v22 = vsel %vm486_vm1, %v1435_v13, 0.0 }
  0xf9   :  { %v378_v18 = vpop.f32.mrf.mxu0  ;;  %545 = vadd.xlane.f32.xlu1 %v544_v14  ;;  %500 = vadd.xlane.f32.xlu0 %v499_v17  ;;  %v442_v19 = vpop.f32.mrf.mxu1 }
  0xfa   :  { %v1442_v20 = vadd.f32 %v1391_v42, %v378_v18  ;;  %v1445_v21 = vadd.f32 %v1391_v42, %v442_v19 }
  0xfb   :  { %v380_v23 = vpop.f32.mrf.mxu0  ;;  %v444_v24 = vpop.f32.mrf.mxu1 }
  0xfc   :  { %v502_v25 = vsel %vm486_vm1, %v1442_v20, 0.0  ;;  %v550_v30 = vsel %vm486_vm1, %v1445_v21, 0.0 }
  0xfd   :  { %v383_v26 = vpop.f32.mrf.mxu0  ;;  %503 = vadd.xlane.f32.xlu1 %v502_v25  ;;  %548 = vadd.xlane.f32.xlu0 %v547_v22  ;;  %v447_v27 = vpop.f32.mrf.mxu1 }
  0xfe   :  { %v1452_v28 = vadd.f32 %v1391_v42, %v383_v26  ;;  %v1455_v29 = vadd.f32 %v1391_v42, %v447_v27 }
  0xff   :  { %v385_v31 = vpop.f32.mrf.mxu0  ;;  %v449_v32 = vpop.f32.mrf.mxu1 }
 0x100   :  { %v505_v33 = vsel %vm486_vm1, %v1452_v28, 0.0  ;;  %v553_v38 = vsel %vm486_vm1, %v1455_v29, 0.0 }
 0x101   :  { %v386_v34 = vpop.f32.mrf.mxu0  ;;  %551 = vadd.xlane.f32.xlu1 %v550_v30  ;;  %506 = vadd.xlane.f32.xlu0 %v505_v33  ;;  %v450_v35 = vpop.f32.mrf.mxu1 }
 0x102   :  { %v1462_v36 = vadd.f32 %v1391_v42, %v386_v34  ;;  %v1465_v37 = vadd.f32 %v1391_v42, %v450_v35 }
 0x103   :  { %v388_v39 = vpop.f32.mrf.mxu0  ;;  %v452_v40 = vpop.f32.mrf.mxu1 }
 0x104   :  { %v508_v41 = vsel %vm486_vm1, %v1462_v36, 0.0  ;;  %v556_v49 = vsel %vm486_vm1, %v1465_v37, 0.0 }
 0x105   :  { %v391_v43 = vpop.f32.mrf.mxu0  ;;  %509 = vadd.xlane.f32.xlu1 %v508_v41  ;;  %554 = vadd.xlane.f32.xlu0 %v553_v38  ;;  %v455_v44 = vpop.f32.mrf.mxu1 }
 0x106   :  { %v1472_v47 = vadd.f32 %v1391_v42, %v391_v43  ;;  %v1475_v48 = vadd.f32 %v1391_v42, %v455_v44 }
 0x107   :  { %v393_v50 = vpop.f32.mrf.mxu0  ;;  %v457_v51 = vpop.f32.mrf.mxu1 }
 0x108   :  { %v511_v53 = vsel %vm486_vm1, %v1472_v47, 0.0  ;;  %v559_v59 = vsel %vm486_vm1, %v1475_v48, 0.0 }
 0x109   :  { %v394_v54 = vpop.f32.mrf.mxu0  ;;  %557 = vadd.xlane.f32.xlu1 %v556_v49  ;;  %512 = vadd.xlane.f32.xlu0 %v511_v53  ;;  %v458_v55 = vpop.f32.mrf.mxu1 }
 0x10a   :  { %v1482_v57 = vadd.f32 %v1391_v42, %v394_v54  ;;  %v1485_v58 = vadd.f32 %v1391_v42, %v458_v55 }
 0x10b   :  { %v396_v62 = vpop.f32.mrf.mxu0  ;;  %v460_v63 = vpop.f32.mrf.mxu1 }
 0x10c   :  { %v514_v0 = vsel %vm486_vm1, %v1482_v57, 0.0  ;;  %v562_v7 = vsel %vm486_vm1, %v1485_v58, 0.0 }
 0x10d   :  { %v399_v1 = vpop.f32.mrf.mxu0  ;;  %515 = vadd.xlane.f32.xlu1 %v514_v0  ;;  %560 = vadd.xlane.f32.xlu0 %v559_v59  ;;  %v463_v2 = vpop.f32.mrf.mxu1 }
 0x10e   :  { %v1492_v3 = vadd.f32 %v1391_v42, %v399_v1  ;;  %v1495_v6 = vadd.f32 %v1391_v42, %v463_v2 }
 0x10f   :  { %v401_v8 = vpop.f32.mrf.mxu0  ;;  %v465_v9 = vpop.f32.mrf.mxu1 }
 0x110   :  { %v517_v10 = vsel %vm486_vm1, %v1492_v3, 0.0  ;;  %v565_v17 = vsel %vm486_vm1, %v1495_v6, 0.0 }
 0x111   :  { %v402_v11 = vpop.f32.mrf.mxu0  ;;  %563 = vadd.xlane.f32.xlu1 %v562_v7  ;;  %518 = vadd.xlane.f32.xlu0 %v517_v10  ;;  %v466_v14 = vpop.f32.mrf.mxu1 }
 0x112   :  { %v1502_v15 = vadd.f32 %v1391_v42, %v402_v11  ;;  %v1505_v16 = vadd.f32 %v1391_v42, %v466_v14 }
 0x113   :  { %v404_v18 = vpop.f32.mrf.mxu0  ;;  %v468_v19 = vpop.f32.mrf.mxu1 }
 0x114   :  { %v520_v22 = vsel %vm486_vm1, %v1502_v15, 0.0  ;;  %v568_v27 = vsel %vm486_vm1, %v1505_v16, 0.0 }
 0x115   :  { %v407_v23 = vpop.f32.mrf.mxu0  ;;  %521 = vadd.xlane.f32.xlu1 %v520_v22  ;;  %566 = vadd.xlane.f32.xlu0 %v565_v17  ;;  %v471_v24 = vpop.f32.mrf.mxu1 }
 0x116   :  { %v1512_v25 = vadd.f32 %v1391_v42, %v407_v23  ;;  %v1515_v26 = vadd.f32 %v1391_v42, %v471_v24 }
 0x117   :  { %v409_v30 = vpop.f32.mrf.mxu0  ;;  %v473_v31 = vpop.f32.mrf.mxu1 }
 0x118   :  { %v523_v32 = vsel %vm486_vm1, %v1512_v25, 0.0  ;;  %v571_v39 = vsel %vm486_vm1, %v1515_v26, 0.0 }
 0x119   :  { %v410_v33 = vpop.f32.mrf.mxu0  ;;  %569 = vadd.xlane.f32.xlu1 %v568_v27  ;;  %524 = vadd.xlane.f32.xlu0 %v523_v32  ;;  %v474_v34 = vpop.f32.mrf.mxu1 }
 0x11a   :  { %v1522_v35 = vadd.f32 %v1391_v42, %v410_v33  ;;  %v1525_v38 = vadd.f32 %v1391_v42, %v474_v34 }
 0x11b   :  { %v412_v40 = vpop.f32.mrf.mxu0  ;;  %v476_v41 = vpop.f32.mrf.mxu1 }
 0x11c   :  { %v526_v43 = vsel %vm486_vm1, %v1522_v35, 0.0  ;;  %v574_v53 = vsel %vm486_vm1, %v1525_v38, 0.0 }
 0x11d   :  { %v415_v44 = vpop.f32.mrf.mxu0  ;;  %527 = vadd.xlane.f32.xlu1 %v526_v43  ;;  %572 = vadd.xlane.f32.xlu0 %v571_v39  ;;  %v479_v49 = vpop.f32.mrf.mxu1 }
 0x11e   :  { %v1532_v50 = vadd.f32 %v1391_v42, %v415_v44  ;;  %v1535_v51 = vadd.f32 %v1391_v42, %v479_v49 }
 0x11f   :  { %v417_v54 = vpop.f32.mrf.mxu0  ;;  %v481_v55 = vpop.f32.mrf.mxu1 }
 0x120   :  { %v529_v59 = vsel %vm486_vm1, %v1532_v50, 0.0  ;;  %v577_v2 = vsel %vm486_vm1, %v1535_v51, 0.0 }
 0x121   :  { %v418_v62 = vpop.f32.mrf.mxu0  ;;  %575 = vadd.xlane.f32.xlu1 %v574_v53  ;;  %530 = vadd.xlane.f32.xlu0 %v529_v59  ;;  %v482_v63 = vpop.f32.mrf.mxu1 }
 0x122   :  { %v1542_v0 = vadd.f32 %v1391_v42, %v418_v62  ;;  %v1545_v1 = vadd.f32 %v1391_v42, %v482_v63 }
 0x123   :  { %v420_v7 = vpop.f32.mrf.mxu0  ;;  %v484_v8 = vpop.f32.mrf.mxu1 }
 0x124   :  { %v532_v9 = vsel %vm486_vm1, %v1542_v0, 0.0  ;;  %v580_v10 = vsel %vm486_vm1, %v1545_v1, 0.0 }
 0x125   :  { %533 = vadd.xlane.f32.xlu1 %v532_v9  ;;  %578 = vadd.xlane.f32.xlu0 %v577_v2 }
 0x129   :  { %581 = vadd.xlane.f32.xlu1 %v580_v10 }
 0x172   :  { %v489_v11 = vpop.xlane.xlu0 %488 }
 0x173   :  { %v584_v14 = vmul.f32 0.010416667, %v489_v11 }
 0x175   :  { %v1554_v17 = vsub.f32 %v1394_v45, %v584_v14 }
 0x176   :  { %v540_v42 = vpop.xlane.xlu1 %539  ;;  %v537_v18 = vpop.xlane.xlu0 %536 }
 0x177   :  { %v600_v19 = vmul.f32 0.010416667, %v537_v18  ;;  %v648_v22 = vmul.f32 %v1554_v17, %v1554_v17  ;;  %v601_v23 = vmul.f32 0.010416667, %v540_v42 }
 0x179   :  { %v1559_v24 = vsub.f32 %v1397_v46, %v600_v19  ;;  %v680_v27 = vsel %vm486_vm1, %v648_v22, 0.0  ;;  %v1565_v34 = vsub.f32 %v1402_v52, %v601_v23 }
 0x17a   :  { %v495_v30 = vpop.xlane.xlu1 %494  ;;  %681 = vadd.xlane.f32.xlu0 %v680_v27  ;;  %v492_v31 = vpop.xlane.xlu0 %491 }
 0x17b   :  { %v586_v32 = vmul.f32 0.010416667, %v495_v30  ;;  %v585_v33 = vmul.f32 0.010416667, %v492_v31  ;;  %v664_v45 = vmul.f32 %v1559_v24, %v1559_v24 }
 0x17d   :  { %v1568_v39 = vsub.f32 %v1412_v60, %v586_v32  ;;  %v1571_v40 = vsub.f32 %v1407_v56, %v585_v33  ;;  %v728_v46 = vsel %vm486_vm1, %v664_v45, 0.0  ;;  %v665_v60 = vmul.f32 %v1565_v34, %v1565_v34 }
 0x17e   :  { %v498_v41 = vpop.xlane.xlu1 %497  ;;  %729 = vadd.xlane.f32.xlu0 %v728_v46  ;;  %v543_v43 = vpop.xlane.xlu0 %542 }
 0x17f   :  { %v587_v44 = vmul.f32 0.010416667, %v498_v41  ;;  %v602_v49 = vmul.f32 0.010416667, %v543_v43  ;;  %v650_v53 = vmul.f32 %v1568_v39, %v1568_v39  ;;  %v649_v52 = vmul.f32 %v1571_v40, %v1571_v40 }
 0x180   :  { %v731_v10 = vsel %vm486_vm1, %v665_v60, 0.0 }
 0x181   :  { %v1581_v54 = vsub.f32 %v1422_v4, %v587_v44  ;;  %v1584_v56 = vsub.f32 %v1415_v61, %v602_v49  ;;  %v686_v55 = vsel %vm486_vm1, %v650_v53, 0.0  ;;  %v683_v59 = vsel %vm486_vm1, %v649_v52, 0.0 }
 0x182   :  { %v546_v62 = vpop.xlane.xlu1 %545  ;;  %687 = vadd.xlane.f32.xlu0 %v686_v55  ;;  %684 = vadd.xlane.f32.xlu1 %v683_v59  ;;  %v501_v63 = vpop.xlane.xlu0 %500 }
 0x183   :  { %v603_v2 = vmul.f32 0.010416667, %v546_v62  ;;  %v588_v7 = vmul.f32 0.010416667, %v501_v63  ;;  %v666_v8 = vmul.f32 %v1584_v56, %v1584_v56  ;;  %v651_v4 = vmul.f32 %v1581_v54, %v1581_v54 }
 0x185   :  { %v1593_v9 = vsub.f32 %v1425_v5, %v603_v2  ;;  %v1596_v61 = vsub.f32 %v1432_v12, %v588_v7  ;;  %v734_v11 = vsel %vm486_vm1, %v666_v8, 0.0  ;;  %v689_v23 = vsel %vm486_vm1, %v651_v4, 0.0 }
 0x186   :  { %v504_v14 = vpop.xlane.xlu1 %503  ;;  %732 = vadd.xlane.f32.xlu1 %v731_v10  ;;  %735 = vadd.xlane.f32.xlu0 %v734_v11  ;;  %v549_v42 = vpop.xlane.xlu0 %548 }
 0x187   :  { %v589_v18 = vmul.f32 0.010416667, %v504_v14  ;;  %v604_v19 = vmul.f32 0.010416667, %v549_v42  ;;  %v652_v22 = vmul.f32 %v1596_v61, %v1596_v61  ;;  %v667_v30 = vmul.f32 %v1593_v9, %v1593_v9 }
 0x189   :  { %v1604_v5 = vsub.f32 %v1442_v20, %v589_v18  ;;  %v1607_v12 = vsub.f32 %v1435_v13, %v604_v19  ;;  %v692_v27 = vsel %vm486_vm1, %v652_v22, 0.0  ;;  %v737_v43 = vsel %vm486_vm1, %v667_v30, 0.0 }
 0x18a   :  { %v552_v31 = vpop.xlane.xlu1 %551  ;;  %690 = vadd.xlane.f32.xlu1 %v689_v23  ;;  %693 = vadd.xlane.f32.xlu0 %v692_v27  ;;  %v507_v32 = vpop.xlane.xlu0 %506 }
 0x18b   :  { %v605_v33 = vmul.f32 0.010416667, %v552_v31  ;;  %v590_v45 = vmul.f32 0.010416667, %v507_v32  ;;  %v668_v46 = vmul.f32 %v1607_v12, %v1607_v12  ;;  %v653_v20 = vmul.f32 %v1604_v5, %v1604_v5 }
 0x18d   :  { %v1617_v13 = vsub.f32 %v1445_v21, %v605_v33  ;;  %v1620_v41 = vsub.f32 %v1452_v28, %v590_v45  ;;  %v740_v44 = vsel %vm486_vm1, %v668_v46, 0.0  ;;  %v695_v59 = vsel %vm486_vm1, %v653_v20, 0.0 }
 0x18e   :  { %v510_v49 = vpop.xlane.xlu1 %509  ;;  %738 = vadd.xlane.f32.xlu1 %v737_v43  ;;  %741 = vadd.xlane.f32.xlu0 %v740_v44  ;;  %v555_v53 = vpop.xlane.xlu0 %554 }
 0x18f   :  { %v591_v52 = vmul.f32 0.010416667, %v510_v49  ;;  %v606_v60 = vmul.f32 0.010416667, %v555_v53  ;;  %v654_v55 = vmul.f32 %v1620_v41, %v1620_v41  ;;  %v669_v63 = vmul.f32 %v1617_v13, %v1617_v13 }
 0x191   :  { %v1628_v21 = vsub.f32 %v1462_v36, %v591_v52  ;;  %v1631_v28 = vsub.f32 %v1455_v29, %v606_v60  ;;  %v698_v62 = vsel %vm486_vm1, %v654_v55, 0.0  ;;  %v743_v14 = vsel %vm486_vm1, %v669_v63, 0.0 }
 0x192   :  { %v558_v2 = vpop.xlane.xlu1 %557  ;;  %696 = vadd.xlane.f32.xlu1 %v695_v59  ;;  %699 = vadd.xlane.f32.xlu0 %v698_v62  ;;  %v513_v7 = vpop.xlane.xlu0 %512 }
 0x193   :  { %v607_v8 = vmul.f32 0.010416667, %v558_v2  ;;  %v592_v4 = vmul.f32 0.010416667, %v513_v7  ;;  %v670_v10 = vmul.f32 %v1631_v28, %v1631_v28  ;;  %v655_v36 = vmul.f32 %v1628_v21, %v1628_v21 }
 0x195   :  { %v1641_v29 = vsub.f32 %v1465_v37, %v607_v8  ;;  %v1644_v11 = vsub.f32 %v1472_v47, %v592_v4  ;;  %v746_v42 = vsel %vm486_vm1, %v670_v10, 0.0  ;;  %v701_v30 = vsel %vm486_vm1, %v655_v36, 0.0 }
 0x196   :  { %v516_v18 = vpop.xlane.xlu1 %515  ;;  %744 = vadd.xlane.f32.xlu1 %v743_v14  ;;  %747 = vadd.xlane.f32.xlu0 %v746_v42  ;;  %v561_v19 = vpop.xlane.xlu0 %560 }
 0x197   :  { %v593_v22 = vmul.f32 0.010416667, %v516_v18  ;;  %v608_v23 = vmul.f32 0.010416667, %v561_v19  ;;  %v656_v27 = vmul.f32 %v1644_v11, %v1644_v11  ;;  %v671_v32 = vmul.f32 %v1641_v29, %v1641_v29 }
 0x199   :  { %v1652_v37 = vsub.f32 %v1482_v57, %v593_v22  ;;  %v1655_v47 = vsub.f32 %v1475_v48, %v608_v23  ;;  %v704_v31 = vsel %vm486_vm1, %v656_v27, 0.0  ;;  %v749_v49 = vsel %vm486_vm1, %v671_v32, 0.0 }
 0x19a   :  { %v564_v33 = vpop.xlane.xlu1 %563  ;;  %702 = vadd.xlane.f32.xlu1 %v701_v30  ;;  %705 = vadd.xlane.f32.xlu0 %v704_v31  ;;  %v519_v45 = vpop.xlane.xlu0 %518 }
 0x19b   :  { %v609_v46 = vmul.f32 0.010416667, %v564_v33  ;;  %v594_v20 = vmul.f32 0.010416667, %v519_v45  ;;  %v672_v43 = vmul.f32 %v1655_v47, %v1655_v47  ;;  %v657_v57 = vmul.f32 %v1652_v37, %v1652_v37 }
 0x19d   :  { %v1665_v48 = vsub.f32 %v1485_v58, %v609_v46  ;;  %v1668_v44 = vsub.f32 %v1492_v3, %v594_v20  ;;  %v752_v53 = vsel %vm486_vm1, %v672_v43, 0.0  ;;  %v707_v63 = vsel %vm486_vm1, %v657_v57, 0.0 }
 0x19e   :  { %v522_v52 = vpop.xlane.xlu1 %521  ;;  %750 = vadd.xlane.f32.xlu1 %v749_v49  ;;  %753 = vadd.xlane.f32.xlu0 %v752_v53  ;;  %v567_v60 = vpop.xlane.xlu0 %566 }
 0x19f   :  { %v595_v55 = vmul.f32 0.010416667, %v522_v52  ;;  %v610_v59 = vmul.f32 0.010416667, %v567_v60  ;;  %v658_v62 = vmul.f32 %v1668_v44, %v1668_v44  ;;  %v673_v7 = vmul.f32 %v1665_v48, %v1665_v48 }
 0x1a1   :  { %v1676_v58 = vsub.f32 %v1502_v15, %v595_v55  ;;  %v1679_v3 = vsub.f32 %v1495_v6, %v610_v59  ;;  %v710_v2 = vsel %vm486_vm1, %v658_v62, 0.0  ;;  %v755_v18 = vsel %vm486_vm1, %v673_v7, 0.0 }
 0x1a2   :  { %v570_v8 = vpop.xlane.xlu1 %569  ;;  %708 = vadd.xlane.f32.xlu1 %v707_v63  ;;  %711 = vadd.xlane.f32.xlu0 %v710_v2  ;;  %v525_v4 = vpop.xlane.xlu0 %524 }
 0x1a3   :  { %v611_v10 = vmul.f32 0.010416667, %v570_v8  ;;  %v596_v36 = vmul.f32 0.010416667, %v525_v4  ;;  %v674_v14 = vmul.f32 %v1679_v3, %v1679_v3  ;;  %v659_v15 = vmul.f32 %v1676_v58, %v1676_v58 }
 0x1a5   :  { %v1689_v6 = vsub.f32 %v1505_v16, %v611_v10  ;;  %v1692_v42 = vsub.f32 %v1512_v25, %v596_v36  ;;  %v758_v19 = vsel %vm486_vm1, %v674_v14, 0.0  ;;  %v713_v32 = vsel %vm486_vm1, %v659_v15, 0.0 }
 0x1a6   :  { %v528_v22 = vpop.xlane.xlu1 %527  ;;  %756 = vadd.xlane.f32.xlu1 %v755_v18  ;;  %759 = vadd.xlane.f32.xlu0 %v758_v19  ;;  %v573_v23 = vpop.xlane.xlu0 %572 }
 0x1a7   :  { %v597_v27 = vmul.f32 0.010416667, %v528_v22  ;;  %v612_v30 = vmul.f32 0.010416667, %v573_v23  ;;  %v660_v31 = vmul.f32 %v1692_v42, %v1692_v42  ;;  %v675_v45 = vmul.f32 %v1689_v6, %v1689_v6 }
 0x1a9   :  { %v1700_v16 = vsub.f32 %v1522_v35, %v597_v27  ;;  %v1703_v25 = vsub.f32 %v1515_v26, %v612_v30  ;;  %v716_v33 = vsel %vm486_vm1, %v660_v31, 0.0  ;;  %v761_v52 = vsel %vm486_vm1, %v675_v45, 0.0 }
 0x1aa   :  { %v576_v46 = vpop.xlane.xlu1 %575  ;;  %714 = vadd.xlane.f32.xlu1 %v713_v32  ;;  %717 = vadd.xlane.f32.xlu0 %v716_v33  ;;  %v531_v20 = vpop.xlane.xlu0 %530 }
 0x1ab   :  { %v613_v43 = vmul.f32 0.010416667, %v576_v46  ;;  %v598_v57 = vmul.f32 0.010416667, %v531_v20  ;;  %v676_v49 = vmul.f32 %v1703_v25, %v1703_v25  ;;  %v661_v35 = vmul.f32 %v1700_v16, %v1700_v16 }
 0x1ad   :  { %v1713_v26 = vsub.f32 %v1525_v38, %v613_v43  ;;  %v1716_v53 = vsub.f32 %v1532_v50, %v598_v57  ;;  %v764_v60 = vsel %vm486_vm1, %v676_v49, 0.0  ;;  %v719_v7 = vsel %vm486_vm1, %v661_v35, 0.0 }
 0x1ae   :  { %v534_v55 = vpop.xlane.xlu1 %533  ;;  %762 = vadd.xlane.f32.xlu1 %v761_v52  ;;  %765 = vadd.xlane.f32.xlu0 %v764_v60  ;;  %v579_v59 = vpop.xlane.xlu0 %578 }
 0x1af   :  { %v599_v62 = vmul.f32 0.010416667, %v534_v55  ;;  %v614_v63 = vmul.f32 0.010416667, %v579_v59  ;;  %v662_v2 = vmul.f32 %v1716_v53, %v1716_v53  ;;  %v677_v4 = vmul.f32 %v1713_v26, %v1713_v26 }
 0x1b1   :  { %v1724_v38 = vsub.f32 %v1542_v0, %v599_v62  ;;  %v1727_v50 = vsub.f32 %v1535_v51, %v614_v63  ;;  %v722_v8 = vsel %vm486_vm1, %v662_v2, 0.0  ;;  %v767_v0 = vsel %vm486_vm1, %v677_v4, 0.0 }
 0x1b2   :  { %v582_v10 = vpop.xlane.xlu1 %581  ;;  %720 = vadd.xlane.f32.xlu1 %v719_v7  ;;  %723 = vadd.xlane.f32.xlu0 %v722_v8 }
 0x1b3   :  { %v615_v36 = vmul.f32 0.010416667, %v582_v10  ;;  %v678_v14 = vmul.f32 %v1727_v50, %v1727_v50  ;;  %v663_v18 = vmul.f32 %v1724_v38, %v1724_v38  ;;  %v1748_v10 = vld [vmem:[%s1982_s3] ss:$0 sm:$0xff] }
 0x1b5   :  { %v1735_v15 = vsub.f32 %v1545_v1, %v615_v36  ;;  %v770_v51 = vsel %vm486_vm1, %v678_v14, 0.0  ;;  %v725_v19 = vsel %vm486_vm1, %v663_v18, 0.0 }
 0x1b6   :  { %768 = vadd.xlane.f32.xlu1 %v767_v0  ;;  %771 = vadd.xlane.f32.xlu0 %v770_v51  ;;  %v1754_v51 = vld [vmem:[%s1983_s4] ss:$0 sm:$0xff] }
 0x1b7   :  { %v679_v22 = vmul.f32 %v1735_v15, %v1735_v15 }
 0x1b9   :  { %v773_v23 = vsel %vm486_vm1, %v679_v22, 0.0 }
 0x1ba   :  { %726 = vadd.xlane.f32.xlu1 %v725_v19 }
 0x1be   :  { %774 = vadd.xlane.f32.xlu1 %v773_v23 }
 0x203   :  { %v682_v1 = vpop.xlane.xlu0 %681 }
 0x204   :  { %v776_v27 = vmul.f32 0.010416667, %v682_v1 }
 0x206   :  { %v808_v30 = vadd.f32 1e-06, %v776_v27 }
 0x207   :  { %v730_v31 = vpop.xlane.xlu0 %729 }
 0x208   :  { %1154 = vrsqrt.f32 %v808_v30  ;;  %v792_v32 = vmul.f32 0.010416667, %v730_v31 }
 0x20a   :  { %v824_v33 = vadd.f32 1e-06, %v792_v32 }
 0x20b   :  { %v685_v45 = vpop.xlane.xlu1 %684  ;;  %v688_v46 = vpop.xlane.xlu0 %687 }
 0x20c   :  { %1156 = vrsqrt.f32 %v824_v33  ;;  %v777_v20 = vmul.f32 0.010416667, %v685_v45  ;;  %v778_v43 = vmul.f32 0.010416667, %v688_v46 }
 0x20e   :  { %v809_v57 = vadd.f32 1e-06, %v777_v20  ;;  %v810_v49 = vadd.f32 1e-06, %v778_v43 }
 0x20f   :  { %v733_v35 = vpop.xlane.xlu1 %732  ;;  %v736_v52 = vpop.xlane.xlu0 %735 }
 0x210   :  { %1158 = vrsqrt.f32 %v809_v57  ;;  %v793_v60 = vmul.f32 0.010416667, %v733_v35  ;;  %v794_v55 = vmul.f32 0.010416667, %v736_v52 }
 0x211   :  { %1160 = vrsqrt.f32 %v810_v49 }
 0x212   :  { %v825_v59 = vadd.f32 1e-06, %v793_v60  ;;  %v826_v62 = vadd.f32 1e-06, %v794_v55 }
 0x213   :  { %v691_v63 = vpop.xlane.xlu1 %690  ;;  %v694_v2 = vpop.xlane.xlu0 %693 }
 0x214   :  { %1162 = vrsqrt.f32 %v825_v59  ;;  %v779_v7 = vmul.f32 0.010416667, %v691_v63  ;;  %v780_v8 = vmul.f32 0.010416667, %v694_v2 }
 0x215   :  { %v1155_v4 = vpop.eup %1154  ;;  %1164 = vrsqrt.f32 %v826_v62 }
 0x216   :  { %v872_v36 = vmul.f32 %v1155_v4, %v1554_v17  ;;  %v811_v14 = vadd.f32 1e-06, %v779_v7  ;;  %v812_v0 = vadd.f32 1e-06, %v780_v8 }
 0x217   :  { %v739_v18 = vpop.xlane.xlu1 %738  ;;  %v742_v19 = vpop.xlane.xlu0 %741 }
 0x218   :  { %v911_v22 = vmul.f32 %v1748_v10, %v872_v36  ;;  %1166 = vrsqrt.f32 %v811_v14  ;;  %v795_v23 = vmul.f32 0.010416667, %v739_v18  ;;  %v796_v1 = vmul.f32 0.010416667, %v742_v19 }
 0x219   :  { %v1157_v27 = vpop.eup %1156  ;;  %1168 = vrsqrt.f32 %v812_v0 }
 0x21a   :  { %v950_v30 = vadd.f32 %v1754_v51, %v911_v22  ;;  %v888_v17 = vmul.f32 %v1157_v27, %v1559_v24  ;;  %v827_v31 = vadd.f32 1e-06, %v795_v23  ;;  %v828_v32 = vadd.f32 1e-06, %v796_v1 }
 0x21b   :  { %v697_v33 = vpop.xlane.xlu1 %696  ;;  %v700_v45 = vpop.xlane.xlu0 %699 }
 0x21c   :  { %982 = vst.msk [vmem:[%s1984_s5] sm:$0xff] %vm486_vm1, %v950_v30  ;;  %v927_v46 = vmul.f32 %v1748_v10, %v888_v17  ;;  %1170 = vrsqrt.f32 %v827_v31  ;;  %v781_v20 = vmul.f32 0.010416667, %v697_v33  ;;  %v782_v43 = vmul.f32 0.010416667, %v700_v45 }
 0x21d   :  { %v1159_v57 = vpop.eup %1158  ;;  %1172 = vrsqrt.f32 %v828_v32 }
 0x21e   :  { %v1161_v49 = vpop.eup %1160  ;;  %v966_v35 = vadd.f32 %v1754_v51, %v927_v46  ;;  %v873_v24 = vmul.f32 %v1159_v57, %v1571_v40  ;;  %v813_v52 = vadd.f32 1e-06, %v781_v20  ;;  %v814_v60 = vadd.f32 1e-06, %v782_v43 }
 0x21f   :  { %v874_v55 = vmul.f32 %v1161_v49, %v1568_v39  ;;  %v745_v59 = vpop.xlane.xlu1 %744  ;;  %v748_v62 = vpop.xlane.xlu0 %747 }
 0x220   :  { %998 = vst.msk [vmem:[%s1984_s5 + $0x80] sm:$0xff] %vm486_vm1, %v966_v35  ;;  %v912_v63 = vmul.f32 %v1748_v10, %v873_v24  ;;  %1174 = vrsqrt.f32 %v813_v52  ;;  %v797_v2 = vmul.f32 0.010416667, %v745_v59  ;;  %v798_v7 = vmul.f32 0.010416667, %v748_v62 }
 0x221   :  { %v1163_v8 = vpop.eup %1162  ;;  %v913_v4 = vmul.f32 %v1748_v10, %v874_v55  ;;  %1176 = vrsqrt.f32 %v814_v60 }
 0x222   :  { %v1165_v40 = vpop.eup %1164  ;;  %v951_v36 = vadd.f32 %v1754_v51, %v912_v63  ;;  %v889_v39 = vmul.f32 %v1163_v8, %v1565_v34  ;;  %v829_v14 = vadd.f32 1e-06, %v797_v2  ;;  %v830_v0 = vadd.f32 1e-06, %v798_v7 }
 0x223   :  { %v952_v18 = vadd.f32 %v1754_v51, %v913_v4  ;;  %v890_v19 = vmul.f32 %v1165_v40, %v1584_v56  ;;  %v703_v22 = vpop.xlane.xlu1 %702  ;;  %v706_v23 = vpop.xlane.xlu0 %705 }
 0x224   :  { %983 = vst.msk [vmem:[%s1984_s5 + $0x8] sm:$0xff] %vm486_vm1, %v951_v36  ;;  %v928_v1 = vmul.f32 %v1748_v10, %v889_v39  ;;  %1178 = vrsqrt.f32 %v829_v14  ;;  %v783_v27 = vmul.f32 0.010416667, %v703_v22  ;;  %v784_v30 = vmul.f32 0.010416667, %v706_v23 }
 0x225   :  { %v1167_v17 = vpop.eup %1166  ;;  %984 = vst.msk [vmem:[%s1984_s5 + $0x10] sm:$0xff] %vm486_vm1, %v952_v18  ;;  %v929_v34 = vmul.f32 %v1748_v10, %v890_v19  ;;  %1180 = vrsqrt.f32 %v830_v0 }
 0x226   :  { %v1169_v56 = vpop.eup %1168  ;;  %v967_v31 = vadd.f32 %v1754_v51, %v928_v1  ;;  %v875_v32 = vmul.f32 %v1167_v17, %v1581_v54  ;;  %v815_v33 = vadd.f32 1e-06, %v783_v27  ;;  %v816_v45 = vadd.f32 1e-06, %v784_v30 }
 0x227   :  { %v968_v46 = vadd.f32 %v1754_v51, %v929_v34  ;;  %v876_v20 = vmul.f32 %v1169_v56, %v1596_v61  ;;  %v751_v43 = vpop.xlane.xlu1 %750  ;;  %v754_v57 = vpop.xlane.xlu0 %753 }
 0x228   :  { %999 = vst.msk [vmem:[%s1984_s5 + $0x88] sm:$0xff] %vm486_vm1, %v967_v31  ;;  %v914_v49 = vmul.f32 %v1748_v10, %v875_v32  ;;  %1182 = vrsqrt.f32 %v815_v33  ;;  %v799_v35 = vmul.f32 0.010416667, %v751_v43  ;;  %v800_v24 = vmul.f32 0.010416667, %v754_v57 }
 0x229   :  { %v1171_v52 = vpop.eup %1170  ;;  %1000 = vst.msk [vmem:[%s1984_s5 + $0x90] sm:$0xff] %vm486_vm1, %v968_v46  ;;  %v915_v54 = vmul.f32 %v1748_v10, %v876_v20  ;;  %1184 = vrsqrt.f32 %v816_v45 }
 0x22a   :  { %v1173_v61 = vpop.eup %1172  ;;  %v953_v60 = vadd.f32 %v1754_v51, %v914_v49  ;;  %v891_v55 = vmul.f32 %v1171_v52, %v1593_v9  ;;  %v831_v59 = vadd.f32 1e-06, %v799_v35  ;;  %v832_v62 = vadd.f32 1e-06, %v800_v24 }
 0x22b   :  { %v954_v63 = vadd.f32 %v1754_v51, %v915_v54  ;;  %v892_v2 = vmul.f32 %v1173_v61, %v1607_v12  ;;  %v709_v7 = vpop.xlane.xlu1 %708  ;;  %v712_v8 = vpop.xlane.xlu0 %711 }
 0x22c   :  { %985 = vst.msk [vmem:[%s1984_s5 + $0x18] sm:$0xff] %vm486_vm1, %v953_v60  ;;  %v930_v4 = vmul.f32 %v1748_v10, %v891_v55  ;;  %1186 = vrsqrt.f32 %v831_v59  ;;  %v785_v40 = vmul.f32 0.010416667, %v709_v7  ;;  %v786_v36 = vmul.f32 0.010416667, %v712_v8 }
 0x22d   :  { %v1175_v39 = vpop.eup %1174  ;;  %986 = vst.msk [vmem:[%s1984_s5 + $0x20] sm:$0xff] %vm486_vm1, %v954_v63  ;;  %v931_v9 = vmul.f32 %v1748_v10, %v892_v2  ;;  %1188 = vrsqrt.f32 %v832_v62 }
 0x22e   :  { %v1177_v12 = vpop.eup %1176  ;;  %v969_v14 = vadd.f32 %v1754_v51, %v930_v4  ;;  %v877_v0 = vmul.f32 %v1175_v39, %v1604_v5  ;;  %v817_v18 = vadd.f32 1e-06, %v785_v40  ;;  %v818_v19 = vadd.f32 1e-06, %v786_v36 }
 0x22f   :  { %v970_v22 = vadd.f32 %v1754_v51, %v931_v9  ;;  %v878_v23 = vmul.f32 %v1177_v12, %v1620_v41  ;;  %v757_v1 = vpop.xlane.xlu1 %756  ;;  %v760_v27 = vpop.xlane.xlu0 %759 }
 0x230   :  { %1001 = vst.msk [vmem:[%s1984_s5 + $0x98] sm:$0xff] %vm486_vm1, %v969_v14  ;;  %v916_v30 = vmul.f32 %v1748_v10, %v877_v0  ;;  %1190 = vrsqrt.f32 %v817_v18  ;;  %v801_v17 = vmul.f32 0.010416667, %v757_v1  ;;  %v802_v34 = vmul.f32 0.010416667, %v760_v27 }
 0x231   :  { %v1179_v56 = vpop.eup %1178  ;;  %1002 = vst.msk [vmem:[%s1984_s5 + $0xa0] sm:$0xff] %vm486_vm1, %v970_v22  ;;  %v917_v5 = vmul.f32 %v1748_v10, %v878_v23  ;;  %1192 = vrsqrt.f32 %v818_v19 }
 0x232   :  { %v1181_v41 = vpop.eup %1180  ;;  %v955_v31 = vadd.f32 %v1754_v51, %v916_v30  ;;  %v893_v32 = vmul.f32 %v1179_v56, %v1617_v13  ;;  %v833_v33 = vadd.f32 1e-06, %v801_v17  ;;  %v834_v45 = vadd.f32 1e-06, %v802_v34 }
 0x233   :  { %v956_v46 = vadd.f32 %v1754_v51, %v917_v5  ;;  %v894_v20 = vmul.f32 %v1181_v41, %v1631_v28  ;;  %v715_v43 = vpop.xlane.xlu1 %714  ;;  %v718_v57 = vpop.xlane.xlu0 %717 }
 0x234   :  { %987 = vst.msk [vmem:[%s1984_s5 + $0x28] sm:$0xff] %vm486_vm1, %v955_v31  ;;  %v932_v49 = vmul.f32 %v1748_v10, %v893_v32  ;;  %1194 = vrsqrt.f32 %v833_v33  ;;  %v787_v35 = vmul.f32 0.010416667, %v715_v43  ;;  %v788_v24 = vmul.f32 0.010416667, %v718_v57 }
 0x235   :  { %v1183_v52 = vpop.eup %1182  ;;  %988 = vst.msk [vmem:[%s1984_s5 + $0x30] sm:$0xff] %vm486_vm1, %v956_v46  ;;  %v933_v13 = vmul.f32 %v1748_v10, %v894_v20  ;;  %1196 = vrsqrt.f32 %v834_v45 }
 0x236   :  { %v1185_v28 = vpop.eup %1184  ;;  %v971_v54 = vadd.f32 %v1754_v51, %v932_v49  ;;  %v879_v61 = vmul.f32 %v1183_v52, %v1628_v21  ;;  %v819_v60 = vadd.f32 1e-06, %v787_v35  ;;  %v820_v55 = vadd.f32 1e-06, %v788_v24 }
 0x237   :  { %v972_v59 = vadd.f32 %v1754_v51, %v933_v13  ;;  %v880_v62 = vmul.f32 %v1185_v28, %v1644_v11  ;;  %v763_v63 = vpop.xlane.xlu1 %762  ;;  %v766_v2 = vpop.xlane.xlu0 %765 }
 0x238   :  { %1003 = vst.msk [vmem:[%s1984_s5 + $0xa8] sm:$0xff] %vm486_vm1, %v971_v54  ;;  %v918_v7 = vmul.f32 %v1748_v10, %v879_v61  ;;  %1198 = vrsqrt.f32 %v819_v60  ;;  %v803_v8 = vmul.f32 0.010416667, %v763_v63  ;;  %v804_v4 = vmul.f32 0.010416667, %v766_v2 }
 0x239   :  { %v1187_v40 = vpop.eup %1186  ;;  %1004 = vst.msk [vmem:[%s1984_s5 + $0xb0] sm:$0xff] %vm486_vm1, %v972_v59  ;;  %v919_v21 = vmul.f32 %v1748_v10, %v880_v62  ;;  %1200 = vrsqrt.f32 %v820_v55 }
 0x23a   :  { %v1189_v11 = vpop.eup %1188  ;;  %v957_v36 = vadd.f32 %v1754_v51, %v918_v7  ;;  %v895_v39 = vmul.f32 %v1187_v40, %v1641_v29  ;;  %v835_v9 = vadd.f32 1e-06, %v803_v8  ;;  %v836_v12 = vadd.f32 1e-06, %v804_v4 }
 0x23b   :  { %v958_v14 = vadd.f32 %v1754_v51, %v919_v21  ;;  %v896_v0 = vmul.f32 %v1189_v11, %v1655_v47  ;;  %v721_v18 = vpop.xlane.xlu1 %720  ;;  %v724_v19 = vpop.xlane.xlu0 %723 }
 0x23c   :  { %989 = vst.msk [vmem:[%s1984_s5 + $0x38] sm:$0xff] %vm486_vm1, %v957_v36  ;;  %v934_v22 = vmul.f32 %v1748_v10, %v895_v39  ;;  %1202 = vrsqrt.f32 %v835_v9  ;;  %v789_v23 = vmul.f32 0.010416667, %v721_v18  ;;  %v790_v1 = vmul.f32 0.010416667, %v724_v19 }
 0x23d   :  { %v1191_v27 = vpop.eup %1190  ;;  %990 = vst.msk [vmem:[%s1984_s5 + $0x40] sm:$0xff] %vm486_vm1, %v958_v14  ;;  %v935_v29 = vmul.f32 %v1748_v10, %v896_v0  ;;  %1204 = vrsqrt.f32 %v836_v12 }
 0x23e   :  { %v1193_v47 = vpop.eup %1192  ;;  %v973_v30 = vadd.f32 %v1754_v51, %v934_v22  ;;  %v881_v17 = vmul.f32 %v1191_v27, %v1652_v37  ;;  %v821_v34 = vadd.f32 1e-06, %v789_v23  ;;  %v822_v56 = vadd.f32 1e-06, %v790_v1 }
 0x23f   :  { %v974_v5 = vadd.f32 %v1754_v51, %v935_v29  ;;  %v882_v41 = vmul.f32 %v1193_v47, %v1668_v44  ;;  %v769_v31 = vpop.xlane.xlu1 %768  ;;  %v772_v32 = vpop.xlane.xlu0 %771 }
 0x240   :  { %1005 = vst.msk [vmem:[%s1984_s5 + $0xb8] sm:$0xff] %vm486_vm1, %v973_v30  ;;  %v920_v33 = vmul.f32 %v1748_v10, %v881_v17  ;;  %1206 = vrsqrt.f32 %v821_v34  ;;  %v805_v45 = vmul.f32 0.010416667, %v769_v31  ;;  %v806_v46 = vmul.f32 0.010416667, %v772_v32 }
 0x241   :  { %v1195_v20 = vpop.eup %1194  ;;  %1006 = vst.msk [vmem:[%s1984_s5 + $0xc0] sm:$0xff] %vm486_vm1, %v974_v5  ;;  %v921_v37 = vmul.f32 %v1748_v10, %v882_v41  ;;  %1208 = vrsqrt.f32 %v822_v56 }
 0x242   :  { %v1197_v44 = vpop.eup %1196  ;;  %v959_v43 = vadd.f32 %v1754_v51, %v920_v33  ;;  %v897_v57 = vmul.f32 %v1195_v20, %v1665_v48  ;;  %v837_v49 = vadd.f32 1e-06, %v805_v45  ;;  %v838_v35 = vadd.f32 1e-06, %v806_v46 }
 0x243   :  { %v960_v24 = vadd.f32 %v1754_v51, %v921_v37  ;;  %v898_v52 = vmul.f32 %v1197_v44, %v1679_v3  ;;  %v727_v13 = vpop.xlane.xlu1 %726 }
 0x244   :  { %991 = vst.msk [vmem:[%s1984_s5 + $0x48] sm:$0xff] %vm486_vm1, %v959_v43  ;;  %v936_v28 = vmul.f32 %v1748_v10, %v897_v57  ;;  %1210 = vrsqrt.f32 %v837_v49  ;;  %v791_v54 = vmul.f32 0.010416667, %v727_v13 }
 0x245   :  { %v1199_v61 = vpop.eup %1198  ;;  %992 = vst.msk [vmem:[%s1984_s5 + $0x50] sm:$0xff] %vm486_vm1, %v960_v24  ;;  %v937_v48 = vmul.f32 %v1748_v10, %v898_v52  ;;  %1212 = vrsqrt.f32 %v838_v35 }
 0x246   :  { %v1201_v3 = vpop.eup %1200  ;;  %v975_v60 = vadd.f32 %v1754_v51, %v936_v28  ;;  %v883_v55 = vmul.f32 %v1199_v61, %v1676_v58  ;;  %v823_v59 = vadd.f32 1e-06, %v791_v54 }
 0x247   :  { %v976_v62 = vadd.f32 %v1754_v51, %v937_v48  ;;  %v884_v63 = vmul.f32 %v1201_v3, %v1692_v42  ;;  %v775_v2 = vpop.xlane.xlu1 %774 }
 0x248   :  { %1007 = vst.msk [vmem:[%s1984_s5 + $0xc8] sm:$0xff] %vm486_vm1, %v975_v60  ;;  %v922_v7 = vmul.f32 %v1748_v10, %v883_v55  ;;  %1214 = vrsqrt.f32 %v823_v59  ;;  %v807_v8 = vmul.f32 0.010416667, %v775_v2 }
 0x249   :  { %v1203_v4 = vpop.eup %1202  ;;  %1008 = vst.msk [vmem:[%s1984_s5 + $0xd0] sm:$0xff] %vm486_vm1, %v976_v62  ;;  %v923_v58 = vmul.f32 %v1748_v10, %v884_v63 }
 0x24a   :  { %v1205_v40 = vpop.eup %1204  ;;  %v961_v42 = vadd.f32 %v1754_v51, %v922_v7  ;;  %v899_v21 = vmul.f32 %v1203_v4, %v1689_v6  ;;  %v839_v11 = vadd.f32 1e-06, %v807_v8 }
 0x24b   :  { %v962_v36 = vadd.f32 %v1754_v51, %v923_v58  ;;  %v900_v39 = vmul.f32 %v1205_v40, %v1703_v25 }
 0x24c   :  { %993 = vst.msk [vmem:[%s1984_s5 + $0x58] sm:$0xff] %vm486_vm1, %v961_v42  ;;  %v938_v9 = vmul.f32 %v1748_v10, %v899_v21  ;;  %1216 = vrsqrt.f32 %v839_v11 }
 0x24d   :  { %v1207_v12 = vpop.eup %1206  ;;  %994 = vst.msk [vmem:[%s1984_s5 + $0x60] sm:$0xff] %vm486_vm1, %v962_v36  ;;  %v939_v6 = vmul.f32 %v1748_v10, %v900_v39 }
 0x24e   :  { %v1209_v14 = vpop.eup %1208  ;;  %v977_v0 = vadd.f32 %v1754_v51, %v938_v9  ;;  %v885_v25 = vmul.f32 %v1207_v12, %v1700_v16 }
 0x24f   :  { %v978_v18 = vadd.f32 %v1754_v51, %v939_v6  ;;  %v886_v19 = vmul.f32 %v1209_v14, %v1716_v53 }
 0x250   :  { %1009 = vst.msk [vmem:[%s1984_s5 + $0xd8] sm:$0xff] %vm486_vm1, %v977_v0  ;;  %v924_v22 = vmul.f32 %v1748_v10, %v885_v25 }
 0x251   :  { %v1211_v23 = vpop.eup %1210  ;;  %1010 = vst.msk [vmem:[%s1984_s5 + $0xe0] sm:$0xff] %vm486_vm1, %v978_v18  ;;  %v925_v1 = vmul.f32 %v1748_v10, %v886_v19 }
 0x252   :  { %v1213_v16 = vpop.eup %1212  ;;  %v963_v27 = vadd.f32 %v1754_v51, %v924_v22  ;;  %v901_v53 = vmul.f32 %v1211_v23, %v1713_v26 }
 0x253   :  { %v964_v29 = vadd.f32 %v1754_v51, %v925_v1  ;;  %v902_v47 = vmul.f32 %v1213_v16, %v1727_v50 }
 0x254   :  { %995 = vst.msk [vmem:[%s1984_s5 + $0x68] sm:$0xff] %vm486_vm1, %v963_v27  ;;  %v940_v30 = vmul.f32 %v1748_v10, %v901_v53 }
 0x255   :  { %v1215_v17 = vpop.eup %1214  ;;  %996 = vst.msk [vmem:[%s1984_s5 + $0x70] sm:$0xff] %vm486_vm1, %v964_v29  ;;  %v941_v34 = vmul.f32 %v1748_v10, %v902_v47 }
 0x256   :  { %v979_v26 = vadd.f32 %v1754_v51, %v940_v30  ;;  %v887_v56 = vmul.f32 %v1215_v17, %v1724_v38 }
 0x257   :  { %v980_v50 = vadd.f32 %v1754_v51, %v941_v34 }
 0x258   :  { %1011 = vst.msk [vmem:[%s1984_s5 + $0xe8] sm:$0xff] %vm486_vm1, %v979_v26  ;;  %v926_v5 = vmul.f32 %v1748_v10, %v887_v56 }
 0x259   :  { %v1217_v41 = vpop.eup %1216  ;;  %1012 = vst.msk [vmem:[%s1984_s5 + $0xf0] sm:$0xff] %vm486_vm1, %v980_v50 }
 0x25a   :  { %v965_v31 = vadd.f32 %v1754_v51, %v926_v5  ;;  %v903_v32 = vmul.f32 %v1217_v41, %v1735_v15 }
 0x25c   :  { %997 = vst.msk [vmem:[%s1984_s5 + $0x78] sm:$0xff] %vm486_vm1, %v965_v31  ;;  %v942_v38 = vmul.f32 %v1748_v10, %v903_v32 }
 0x25e   :  { %v981_v33 = vadd.f32 %v1754_v51, %v942_v38 }
 0x260   :  { %1013 = vst.msk [vmem:[%s1984_s5 + $0xf8] sm:$0xff] %vm486_vm1, %v981_v33 }

</bundles_post_ra>
